<compile_context>
chip_gen: v7x
topology: tpu7x:2x2x1
jax: 0.10.0
libtpu: 0.0.40
codegen_flags: <defaults>
</compile_context>

<pallas_src>
import jax
import jax.numpy as jnp
import numpy as np
from jax.experimental import pallas as pl
from jax.experimental.pallas import tpu as pltpu


def _round_up(n: int, m: int) -> int:
    return (n + m - 1) // m * m


def _vmem_capacity_bytes() -> int:
    """Physical VMEM per TensorCore; conservative 64 MiB (v7x) if unqueryable."""
    try:
        info = pltpu.get_tpu_info()
        cap = getattr(info, "vmem_capacity_bytes", None)
        if cap:
            return int(cap)
    except Exception:
        pass
    return 64 * 1024 * 1024


def _resident_spec(shape, index_map):
    """BlockSpec for a grid-invariant block: single-buffer it (no re-DMA is
    ever needed) so resident weights are not doubled in VMEM (matters on
    v7x's 64 MiB per TensorCore)."""
    try:
        return pl.BlockSpec(shape, index_map, pipeline_mode=pl.Buffered(1))
    except (TypeError, AttributeError):
        return pl.BlockSpec(shape, index_map)   # older JAX: default buffering


def _choose_tile(batch: int, set_size: int, row_tile: int):
    """Pick a row tile over the flattened (B*S) row axis.

    Returns (tile_s, s_pad) with the invariants:
      * tile_s divides batch * s_pad
      * (s_pad % tile_s == 0) or (tile_s % s_pad == 0)
        (each tile lies inside one set, or covers whole sets)
    s_pad == set_size unless no aligned tiling exists (rare fallback)."""
    row_tile = max(16, int(row_tile))

    def pick(s):
        n = batch * s
        if n <= row_tile:                 # whole problem in one full-extent tile
            return n
        best8 = None
        if s <= row_tile:                 # small sets: several whole sets / tile
            for nb in range(row_tile // s, 0, -1):
                if batch % nb:
                    continue
                t = nb * s
                if t % 16 == 0:
                    return t
                if best8 is None and t % 8 == 0:
                    best8 = t
        for t in range(min(row_tile, s), 0, -1):   # large sets: tile divides set
            if s % t:
                continue
            if t % 16 == 0:
                return t
            if best8 is None and t % 8 == 0:
                best8 = t
        return best8

    t = pick(set_size)
    if t is not None:
        return t, set_size
    s_pad = _round_up(set_size, 16)       # fallback: pad S (extra HBM copy of x)
    return pick(s_pad), s_pad


def _make_rff_kernel(n_layers: int, tile_s: int, set_size: int, mode: str,
                     compute_dtype):
    """Fused MLP kernel: n_layers linears, ReLU between them, final row mask."""
    nb = tile_s // set_size if mode == "multi" else 1

    def kernel(len_ref, x_ref, *rest):
        # rest = (W_0, b_0, ..., W_{L-1}, b_{L-1}, out)
        wb_refs = rest[:2 * n_layers]
        o_ref = rest[2 * n_layers]
        j = pl.program_id(0)

        # f32 -> bf16 cast in-kernel (VPU filler under DMA/MXU); the HBM read
        # of x stays at its natural (unpadded) feature width.
        h = x_ref[...].astype(compute_dtype)
        for i in range(n_layers):
            w = wb_refs[2 * i][...]          # bf16, VMEM-resident, single-buffered
            b = wb_refs[2 * i + 1][...]      # (1, n_i) f32
            h = jnp.dot(h, w, preferred_element_type=jnp.float32) + b
            if i < n_layers - 1:
                # torch.nn.ReLU in f32, cast back so the next matmul feeds the
                # MXU in bf16.
                h = jnp.maximum(h, 0.0).astype(compute_dtype)
        # h: (tile_s, d_out) float32

        # apply_masks: zero rows with set-index >= lengths[b].  Mask rebuilt
        # in-kernel from the scalar-prefetched lengths in SMEM (no HBM mask
        # stream).
        if mode == "within":                 # tile lies inside one set
            row0 = j * tile_s
            b_idx = row0 // set_size
            s0 = row0 - b_idx * set_size
            s_idx = s0 + jax.lax.broadcasted_iota(jnp.int32, (tile_s, 1), 0)
            valid = s_idx < len_ref[b_idx]
            o_ref[...] = jnp.where(valid, h, 0.0).astype(o_ref.dtype)
        else:                                # "multi": tile covers nb whole sets
            s_idx = jax.lax.broadcasted_iota(jnp.int32, (set_size, 1), 0)
            for bi in range(nb):             # nb is static -> unrolled
                valid = s_idx < len_ref[j * nb + bi]
                seg = h[bi * set_size:(bi + 1) * set_size]
                o_ref[pl.ds(bi * set_size, set_size), :] = (
                    jnp.where(valid, seg, 0.0).astype(o_ref.dtype))

    return kernel


def prepare_rff_params(weights, biases, compute_dtype=jnp.bfloat16):
    """Pad hidden dims to 128-lane multiples and cast to the MXU compute dtype
    ONCE (cache the result; do not rebuild per forward call).  Layer-0 input
    dim and last-layer output dim stay unpadded so x / out need no feature
    padding and no post-kernel slice."""
    n = len(weights)
    dims = [weights[0].shape[0]] + [w.shape[1] for w in weights]
    params = []
    for i, (w, b) in enumerate(zip(weights, biases)):
        ki = dims[i] if i == 0 else _round_up(dims[i], 128)
        ni = dims[i + 1] if i == n - 1 else _round_up(dims[i + 1], 128)
        w_p = jnp.zeros((ki, ni), compute_dtype)
        w_p = w_p.at[:dims[i], :dims[i + 1]].set(w.astype(compute_dtype))
        b_p = jnp.zeros((1, ni), jnp.float32)
        b_p = b_p.at[0, :dims[i + 1]].set(b.astype(jnp.float32))
        params.append((w_p, b_p))
    return params


def rff_forward(x, lengths, params, *, row_tile: int = 512, out_dtype=None):
    """Pallas RFF forward.

    x:        (B, S, input_dim) float32 (or bf16)
    lengths:  (B,) int
    params:   output of prepare_rff_params (padded/cast weights & biases)
    returns:  (B, S, output_dim) in out_dtype (default x.dtype)
    """
    B, S, d_in = x.shape
    n_layers = len(params)
    assert params[0][0].shape[0] == d_in, "x feature dim does not match layer 0"
    d_out = params[-1][0].shape[1]
    compute_dtype = params[0][0].dtype
    out_dtype = jnp.dtype(out_dtype or x.dtype)
    lengths = lengths.astype(jnp.int32)

    tile_s, s_pad = _choose_tile(B, S, row_tile)
    if s_pad != S:
        # TODO(synk): only taken when S admits no aligned tiling; costs one
        # extra HBM copy of x (and an output slice below).
        x = jnp.pad(x, ((0, 0), (0, s_pad - S), (0, 0)))
    n_rows = B * s_pad
    # Contiguous leading-dim merge: metadata-only reshape, no HBM copy.
    x2 = x.reshape(n_rows, d_in)

    mode = "within" if s_pad % tile_s == 0 else "multi"
    if mode == "multi":
        assert tile_s % s_pad == 0

    in_specs = [pl.BlockSpec((tile_s, d_in), lambda j, lens: (j, 0))]
    flat_wb = []
    for w_p, b_p in params:
        flat_wb += [w_p, b_p]
        in_specs += [_resident_spec(w_p.shape, lambda j, lens: (0, 0)),
                     _resident_spec(b_p.shape, lambda j, lens: (0, 0))]

    # VMEM budget: double-buffered x/out tiles, single-buffered resident
    # weights/biases, plus the f32 intermediate activations (2 live widths).
    def lane(d):
        return _round_up(d, 128)

    max_hidden = max(lane(w_p.shape[1]) for w_p, _ in params)
    x_bytes = 2 * tile_s * lane(d_in) * jnp.dtype(x.dtype).itemsize
    o_bytes = 2 * tile_s * lane(d_out) * out_dtype.itemsize
    w_bytes = sum(
        _round_up(w_p.shape[0], 16) * lane(w_p.shape[1]) * w_p.dtype.itemsize
        + 8 * lane(b_p.shape[1]) * 4
        for w_p, b_p in params)
    act_bytes = 2 * tile_s * max_hidden * 4
    budget = x_bytes + o_bytes + w_bytes + act_bytes
    cap = _vmem_capacity_bytes()
    vmem_limit = int(min(cap - 8 * 1024 * 1024,
                         max(32 * 1024 * 1024, int(1.3 * budget))))

    out = pl.pallas_call(
        _make_rff_kernel(n_layers, tile_s, s_pad, mode, compute_dtype),
        out_shape=jax.ShapeDtypeStruct((n_rows, d_out), out_dtype),
        grid_spec=pltpu.PrefetchScalarGridSpec(
            num_scalar_prefetch=1,                    # lengths -> SMEM
            grid=(n_rows // tile_s,),
            in_specs=in_specs,
            out_specs=pl.BlockSpec((tile_s, d_out), lambda j, lens: (j, 0)),
        ),
        compiler_params=pltpu.CompilerParams(
            dimension_semantics=("parallel",),        # megacore splits row tiles
            vmem_limit_bytes=vmem_limit,
        ),
    )(lengths, x2, *flat_wb)

    out = out.reshape(B, s_pad, d_out)
    if s_pad != S:
        out = out[:, :S, :]
    return out


def init_rff_params(key, input_dim, output_dim, intermediate_dims):
    """Kaiming-normal (fan_in, relu) weights, zero biases — matches _reset_parameters."""
    dims = [input_dim] + list(intermediate_dims) + [output_dim]
    weights, biases = [], []
    for i in range(len(dims) - 1):
        key, sub = jax.random.split(key)
        fan_in = dims[i]
        std = np.sqrt(2.0 / fan_in)  # kaiming_normal_, mode='fan_in', relu gain
        w = jax.random.normal(sub, (dims[i], dims[i + 1]), dtype=jnp.float32) * std
        b = jnp.zeros((dims[i + 1],), dtype=jnp.float32)
        weights.append(w)
        biases.append(b)
    return weights, biases


def _reference_rff(x, lengths, weights, biases, compute_dtype=jnp.float32):
    h = x.astype(compute_dtype)
    for i, (w, b) in enumerate(zip(weights, biases)):
        h = jnp.dot(h, w.astype(compute_dtype),
                    preferred_element_type=jnp.float32) + b
        if i < len(weights) - 1:
            h = jnp.maximum(h, 0.0).astype(compute_dtype)
    pos = jax.lax.broadcasted_iota(jnp.int32, h.shape[:2], dimension=1)
    mask = (pos < lengths[:, None])[..., None]
    return jnp.where(mask, h, 0.0).astype(x.dtype)


if __name__ == "__main__":
    # Small, deterministic example: batch=2, set_size=16, input_dim=16,
    # intermediate_dims=[32], output_dim=16, condition_dim=0, norm=None, dropout=0
    B, S = 2, 16
    input_dim, output_dim = 16, 16
    intermediate_dims = [32]

    key = jax.random.PRNGKey(0)
    key, kx = jax.random.split(key)
    x = jax.random.normal(kx, (B, S, input_dim), dtype=jnp.float32)
    lengths = jnp.array([13, 7], dtype=jnp.int32)

    weights, biases = init_rff_params(key, input_dim, output_dim, intermediate_dims)
    params = prepare_rff_params(weights, biases)   # pad + cast ONCE (cacheable)

    out = rff_forward(x, lengths, params)
    out = jax.block_until_ready(out)
    assert out.shape == (B, S, output_dim)

    # Matched-precision reference (bf16 matmuls, f32 accumulation) -> tight check.
    ref_bf16 = _reference_rff(x, lengths, weights, biases,
                              compute_dtype=jnp.bfloat16)
    np.testing.assert_allclose(np.asarray(out), np.asarray(ref_bf16),
                               rtol=2e-3, atol=2e-3)

    # Pure-f32 reference -> loose check (only bf16 quantization of x / W differs).
    ref_f32 = _reference_rff(x, lengths, weights, biases,
                             compute_dtype=jnp.float32)
    np.testing.assert_allclose(np.asarray(out), np.asarray(ref_f32),
                               rtol=5e-2, atol=5e-2)

    print("KERNEL_OK")
</pallas_src>

<mosaic_0001>
module attributes {stable_mosaic.version = 11 : i64} {
  func.func @kernel(%arg0: i32, %arg1: memref<2xi32, #tpu.memory_space<smem>>, %arg2: memref<32x16xf32, #tpu.memory_space<vmem>>, %arg3: memref<16x128xbf16, #tpu.memory_space<vmem>>, %arg4: memref<1x128xf32, #tpu.memory_space<vmem>>, %arg5: memref<128x16xbf16, #tpu.memory_space<vmem>>, %arg6: memref<1x16xf32, #tpu.memory_space<vmem>>, %arg7: memref<32x16xf32, #tpu.memory_space<vmem>>) attributes {dimension_semantics = [#tpu.dimension_semantics<parallel>], iteration_bounds = array<i64: 1>, scalar_prefetch = 1 : i64, scratch_operands = 0 : i64, tpu.core_type = #tpu.core_type<tc>, window_params = [{transform_indices = @transform_0, window_bounds = array<i64: 32, 16>}, {pipeline_mode = #tpu.pipeline_mode<synchronous>, transform_indices = @transform_1, window_bounds = array<i64: 16, 128>}, {pipeline_mode = #tpu.pipeline_mode<synchronous>, transform_indices = @transform_2, window_bounds = array<i64: 1, 128>}, {pipeline_mode = #tpu.pipeline_mode<synchronous>, transform_indices = @transform_3, window_bounds = array<i64: 128, 16>}, {pipeline_mode = #tpu.pipeline_mode<synchronous>, transform_indices = @transform_4, window_bounds = array<i64: 1, 16>}, {transform_indices = @transform_5, window_bounds = array<i64: 32, 16>}]} {
    %c0 = arith.constant 0 : index
    %c0_0 = arith.constant 0 : index
    %0 = vector.load %arg2[%c0, %c0_0] : memref<32x16xf32, #tpu.memory_space<vmem>>, vector<32x16xf32>
    %1 = arith.truncf %0 : vector<32x16xf32> to vector<32x16xbf16>
    %c0_1 = arith.constant 0 : index
    %c0_2 = arith.constant 0 : index
    %2 = vector.load %arg3[%c0_1, %c0_2] : memref<16x128xbf16, #tpu.memory_space<vmem>>, vector<16x128xbf16>
    %c0_3 = arith.constant 0 : index
    %c0_4 = arith.constant 0 : index
    %3 = vector.load %arg4[%c0_3, %c0_4] : memref<1x128xf32, #tpu.memory_space<vmem>>, vector<1x128xf32>
    %cst = arith.constant dense<0.000000e+00> : vector<32x128xf32>
    %4 = tpu.matmul %1, %2, %cst {dimension_numbers = #tpu.dot_dimension_numbers<[1], [0], [0], [1], [0, 0, 1, 1], [], []>} : vector<32x16xbf16>, vector<16x128xbf16>, vector<32x128xf32> -> vector<32x128xf32>
    %5 = vector.broadcast %3 : vector<1x128xf32> to vector<32x128xf32>
    %6 = arith.addf %4, %5 : vector<32x128xf32>
    %cst_5 = arith.constant 0.000000e+00 : f32
    %7 = vector.broadcast %cst_5 : f32 to vector<32x128xf32>
    %8 = arith.maximumf %6, %7 : vector<32x128xf32>
    %9 = arith.truncf %8 : vector<32x128xf32> to vector<32x128xbf16>
    %c0_6 = arith.constant 0 : index
    %c0_7 = arith.constant 0 : index
    %10 = vector.load %arg5[%c0_6, %c0_7] : memref<128x16xbf16, #tpu.memory_space<vmem>>, vector<128x16xbf16>
    %c0_8 = arith.constant 0 : index
    %c0_9 = arith.constant 0 : index
    %11 = vector.load %arg6[%c0_8, %c0_9] : memref<1x16xf32, #tpu.memory_space<vmem>>, vector<1x16xf32>
    %cst_10 = arith.constant dense<0.000000e+00> : vector<32x16xf32>
    %12 = tpu.matmul %9, %10, %cst_10 {dimension_numbers = #tpu.dot_dimension_numbers<[1], [0], [0], [1], [0, 0, 1, 1], [], []>} : vector<32x128xbf16>, vector<128x16xbf16>, vector<32x16xf32> -> vector<32x16xf32>
    %13 = vector.broadcast %11 : vector<1x16xf32> to vector<32x16xf32>
    %14 = arith.addf %12, %13 : vector<32x16xf32>
    %15 = tpu.iota {dimensions = array<i32: 0>} : vector<16x1xi32>
    %c2_i32 = arith.constant 2 : i32
    %16 = arith.muli %arg0, %c2_i32 : i32
    %c0_i32 = arith.constant 0 : i32
    %17 = arith.addi %16, %c0_i32 : i32
    %18 = arith.index_cast %17 : i32 to index
    %19 = memref.load %arg1[%18] : memref<2xi32, #tpu.memory_space<smem>>
    %20 = vector.broadcast %19 : i32 to vector<16x1xi32>
    %21 = arith.cmpi slt, %15, %20 : vector<16x1xi32>
    %22 = vector.extract_strided_slice %14 {offsets = [0, 0], sizes = [16, 16], strides = [1, 1]} : vector<32x16xf32> to vector<16x16xf32>
    %cst_11 = arith.constant 0.000000e+00 : f32
    %23 = vector.shape_cast %21 : vector<16x1xi1> to vector<16x1xi1>
    %24 = vector.broadcast %23 : vector<16x1xi1> to vector<16x16xi1>
    %25 = vector.broadcast %cst_11 : f32 to vector<16x16xf32>
    %26 = arith.select %24, %22, %25 : vector<16x16xi1>, vector<16x16xf32>
    %c0_12 = arith.constant 0 : index
    %c0_13 = arith.constant 0 : index
    %27 = vector.load %arg7[%c0_12, %c0_13] : memref<32x16xf32, #tpu.memory_space<vmem>>, vector<16x16xf32>
    tpu.vector_store %arg7[%c0_12, %c0_13], %26 {strides = array<i32>} : memref<32x16xf32, #tpu.memory_space<vmem>>, vector<16x16xf32>,
    %c2_i32_14 = arith.constant 2 : i32
    %28 = arith.muli %arg0, %c2_i32_14 : i32
    %c1_i32 = arith.constant 1 : i32
    %29 = arith.addi %28, %c1_i32 : i32
    %30 = arith.index_cast %29 : i32 to index
    %31 = memref.load %arg1[%30] : memref<2xi32, #tpu.memory_space<smem>>
    %32 = vector.broadcast %31 : i32 to vector<16x1xi32>
    %33 = arith.cmpi slt, %15, %32 : vector<16x1xi32>
    %34 = vector.extract_strided_slice %14 {offsets = [16, 0], sizes = [16, 16], strides = [1, 1]} : vector<32x16xf32> to vector<16x16xf32>
    %cst_15 = arith.constant 0.000000e+00 : f32
    %35 = vector.shape_cast %33 : vector<16x1xi1> to vector<16x1xi1>
    %36 = vector.broadcast %35 : vector<16x1xi1> to vector<16x16xi1>
    %37 = vector.broadcast %cst_15 : f32 to vector<16x16xf32>
    %38 = arith.select %36, %34, %37 : vector<16x16xi1>, vector<16x16xf32>
    %c16 = arith.constant 16 : index
    %c0_16 = arith.constant 0 : index
    %39 = vector.load %arg7[%c16, %c0_16] : memref<32x16xf32, #tpu.memory_space<vmem>>, vector<16x16xf32>
    tpu.vector_store %arg7[%c16, %c0_16], %38 {strides = array<i32>} : memref<32x16xf32, #tpu.memory_space<vmem>>, vector<16x16xf32>,
    return
  }
  func.func @transform_0(%arg0: i32, %arg1: memref<2xi32, #tpu.memory_space<smem>>) -> (i32, i32) {
    %c0_i32 = arith.constant 0 : i32
    %c0_i32_0 = arith.constant 0 : i32
    return %arg0, %c0_i32 : i32, i32
  }
  func.func @transform_1(%arg0: i32, %arg1: memref<2xi32, #tpu.memory_space<smem>>) -> (i32, i32) {
    %c0_i32 = arith.constant 0 : i32
    %c0_i32_0 = arith.constant 0 : i32
    %c0_i32_1 = arith.constant 0 : i32
    return %c0_i32, %c0_i32_0 : i32, i32
  }
  func.func @transform_2(%arg0: i32, %arg1: memref<2xi32, #tpu.memory_space<smem>>) -> (i32, i32) {
    %c0_i32 = arith.constant 0 : i32
    %c0_i32_0 = arith.constant 0 : i32
    %c0_i32_1 = arith.constant 0 : i32
    return %c0_i32, %c0_i32_0 : i32, i32
  }
  func.func @transform_3(%arg0: i32, %arg1: memref<2xi32, #tpu.memory_space<smem>>) -> (i32, i32) {
    %c0_i32 = arith.constant 0 : i32
    %c0_i32_0 = arith.constant 0 : i32
    %c0_i32_1 = arith.constant 0 : i32
    return %c0_i32, %c0_i32_0 : i32, i32
  }
  func.func @transform_4(%arg0: i32, %arg1: memref<2xi32, #tpu.memory_space<smem>>) -> (i32, i32) {
    %c0_i32 = arith.constant 0 : i32
    %c0_i32_0 = arith.constant 0 : i32
    %c0_i32_1 = arith.constant 0 : i32
    return %c0_i32, %c0_i32_0 : i32, i32
  }
  func.func @transform_5(%arg0: i32, %arg1: memref<2xi32, #tpu.memory_space<smem>>) -> (i32, i32) {
    %c0_i32 = arith.constant 0 : i32
    %c0_i32_0 = arith.constant 0 : i32
    return %arg0, %c0_i32 : i32, i32
  }
}

</mosaic_0001>

<bundles_post_ra>
// kernel: tpu_custom_call.1
= control target key start
LH: loop header
LB: loop body
LE: loop exit
PB: predicated region body
PF: predicated region fallthrough
CT: control target
= control target key end

     0   :  { %s443_s0 = inlined_call_operand.vmem [shape: s32[2], index: 0, kind: input, shape index: {}]   ;;  %s444_s1 = inlined_call_operand.vmem [shape: f32[32,16], index: 1, kind: input, shape index: {}]   ;;  %s445_s2 = inlined_call_operand.vmem [shape: bf16[16,128], index: 2, kind: input, shape index: {}]   ;;  %s446_s3 = inlined_call_operand.vmem [shape: f32[1,128], index: 3, kind: input, shape index: {}]   ;;  %s447_s4 = inlined_call_operand.vmem [shape: bf16[128,16], index: 4, kind: input, shape index: {}]   ;;  %s448_s5 = inlined_call_operand.vmem [shape: f32[1,16], index: 5, kind: input, shape index: {}]   ;;  %s449_s6 = inlined_call_operand.vmem [shape: f32[32,16], index: 6, kind: output, shape index: {}]  }
   0x1   :  { %s11_s23 = sshll.u32 %s443_s0, 4  ;;  %s12_s23 = int_to_ptr.vmem [resolvable:$true] %s11_s23 }
   0x2   :  { %s327_s24 = scalar_lea.vmem %s12_s23, 16  ;;  %p332_p1 = scmp.lt.s32.totalorder %s12_s23, %s12_s23 }
   0x3   :  { %p328_p0 = scmp.ne.s32.totalorder %s12_s23, %s327_s24  ;;  %p333_p2 = scmp.lt.s32.totalorder %s327_s24, %s327_s24 }
   0x5   :  { %p334_p3 = por %p333_p2, %p332_p1 }
   0x7   :  { %p335_p4 = pnand %p334_p3, %p328_p0 }
   0x9   :  { %338 = shalt.err (!%p335_p4)  }
   0xa   :  { %s341_s25 = smov [#allocation3]  }
   0xb   :  { %14 = dma.vmem_to_smem %s12_s23, 16, %s341_s25, [#allocation2] }
   0xc   :  { %339 = dma.done.wait [#allocation2], 16 }
   0xd   :  { %340 = vsyncadd [#allocation2], 4294967280 }
   0xe   :  { %16 = sfence }
   0xf   :  { %v318_v0 = vld [vmem:[%s445_s2] sm:$0xff]   ;;  %v29_v2 = vld [vmem:[%s444_s1 + $0x8] sm:$0xff]  ;;  %vm49_vm0 = vcmask 130048   ;;  %v30_v3 = vld [vmem:[%s444_s1 + $0x10] sm:$0xff]  ;;  %v231_v30 = vlaneseq  ;;  %s235_s27 = sld [smem:[#allocation3]] }
  0x10   :  { %v28_v1 = vld [vmem:[%s444_s1] sm:$0xff]  ;;  %291 = vmatprep.subr.bf16.mxu0 %v318_v0  ;;  %v31_v5 = vld [vmem:[%s444_s1 + $0x18] sm:$0xff]  ;;  %v320_v8 = vld [vmem:[%s447_s4 + $0x8] sm:$0xff]  }
  0x11   :  { %v32_v4 = vpack.c.bf16 %v29_v2, %v28_v1  ;;  %292 = vmatpush3.bf16.msra.mxu0 %v318_v0  ;;  %v33_v6 = vpack.c.bf16 %v31_v5, %v30_v3  ;;  %v319_v7 = vld [vmem:[%s447_s4] sm:$0xff]   ;;  %v321_v9 = vld [vmem:[%s447_s4 + $0x10] sm:$0xff]   ;;  %v322_v10 = vld [vmem:[%s447_s4 + $0x18] sm:$0xff]   ;;  %v232_v31 = vshrl.u32 %v231_v30, 7 }
  0x12   :  { %297 = vmatprep.subr.bf16.mxu1 %v319_v7  ;;  %v323_v11 = vld [vmem:[%s447_s4 + $0x20] sm:$0xff]   ;;  %v324_v12 = vld [vmem:[%s447_s4 + $0x28] sm:$0xff]   ;;  %v325_v13 = vld [vmem:[%s447_s4 + $0x30] sm:$0xff]  }
  0x13   :  { %293 = vmatprep.mubr.msk.bf16.mxu0 %vm49_vm0, %v32_v4  ;;  %298 = vmatpush3.bf16.msra.mxu1 %v319_v7  ;;  %v326_v14 = vld [vmem:[%s447_s4 + $0x38] sm:$0xff]   ;;  %v264_v15 = vld [vmem:[%s446_s3] ss:$0 sm:$0xff]  ;;  %s277_s4 = sld [smem:[#allocation3 + $0x1]]  ;;  %v233_v35 = vadd.s32 8, %v232_v31 }
  0x14   :  { %294 = vmatmul.mubr.msk.bf16.vlgmr.msra.gmra.mrb[0].mxu0 %vm49_vm0, %v33_v6  ;;  %299 = vmatprep.subr.bf16.mxu1 %v320_v8  ;;  %v268_v33 = vld [vmem:[%s448_s5] ss:$0 sm:$0xff] }
  0x15   :  { %v236_v34 = vstv %s235_s27 }
  0x16   :  { %vm237_vm2 = vcmp.lt.s32.totalorder %v232_v31, %v236_v34  ;;  %vm238_vm4 = vcmp.lt.s32.totalorder %v233_v35, %v236_v34 }
  0x17   :  { %300 = vmatpush3.bf16.msra.mxu1 %v320_v8 }
  0x18   :  { %301 = vmatprep.subr.bf16.mxu1 %v321_v9 }
  0x19   :  { %v249_v32 = vstv %s277_s4 }
  0x1a   :  { %vm250_vm1 = vcmp.lt.s32.totalorder %v232_v31, %v249_v32  ;;  %vm251_vm3 = vcmp.lt.s32.totalorder %v233_v35, %v249_v32 }
  0x1b   :  { %302 = vmatpush3.bf16.msra.mxu1 %v321_v9 }
  0x1c   :  { %303 = vmatprep.subr.bf16.mxu1 %v322_v10 }
  0x1f   :  { %304 = vmatpush3.bf16.msra.mxu1 %v322_v10 }
  0x20   :  { %305 = vmatprep.subr.bf16.mxu1 %v323_v11 }
  0x23   :  { %306 = vmatpush3.bf16.msra.mxu1 %v323_v11 }
  0x24   :  { %307 = vmatprep.subr.bf16.mxu1 %v324_v12 }
  0x27   :  { %308 = vmatpush3.bf16.msra.mxu1 %v324_v12 }
  0x28   :  { %309 = vmatprep.subr.bf16.mxu1 %v325_v13 }
  0x2b   :  { %310 = vmatpush3.bf16.msra.mxu1 %v325_v13 }
  0x2c   :  { %311 = vmatprep.subr.bf16.mxu1 %v326_v14 }
  0x2f   :  { %312 = vmatpush3.bf16.msra.mxu1 %v326_v14 }
  0xe7   :  { %v295_v16 = vpop.f32.mrb[0].mxu0 }
  0xe8   :  { %v99_v17 = vadd.f32 %v295_v16, %v264_v15  ;;  %v90_v18 = vpop.f32.mrb[1].mxu0 }
  0xe9   :  { %v91_v19 = vadd.f32 %v264_v15, %v90_v18  ;;  %v296_v20 = vpop.f32.mrb[2].mxu0 }
  0xea   :  { %v102_v21 = vadd.f32 %v296_v20, %v264_v15  ;;  %v93_v22 = vpop.f32.mrb[3].mxu0  ;;  %v107_v24 = vmax.f32 %v99_v17, 0.0 }
  0xeb   :  { %v94_v23 = vadd.f32 %v264_v15, %v93_v22  ;;  %v105_v26 = vmax.f32 %v91_v19, 0.0 }
  0xec   :  { %v108_v25 = vmax.f32 %v102_v21, 0.0 }
  0xed   :  { %v106_v27 = vmax.f32 %v94_v23, 0.0 }
  0xee   :  { %v110_v28 = vpack.c.bf16 %v108_v25, %v107_v24 }
  0xef   :  { %v109_v29 = vpack.c.bf16 %v106_v27, %v105_v26 }
  0xf1   :  { %313 = vmatprep.mubr.bf16.mxu1 %v109_v29 }
  0xf2   :  { %314 = vmatmul.mubr.bf16.vlgmr.msra.gmra.mrb[0].mxu1 %v110_v28 }
 0x1c5   :  { %v315_v36 = vpop.f32.mrb[0].mxu1 }
 0x1c6   :  { %v225_v37 = vadd.f32 %v315_v36, %v268_v33  ;;  %v216_v38 = vpop.f32.mrb[1].mxu1 }
 0x1c7   :  { %v217_v39 = vadd.f32 %v268_v33, %v216_v38  ;;  %v316_v40 = vpop.f32.mrb[2].mxu1 }
 0x1c8   :  { %v256_v41 = vsel %vm250_vm1, %v225_v37, 0.0  ;;  %v228_v42 = vadd.f32 %v316_v40, %v268_v33  ;;  %v219_v43 = vpop.f32.mrb[3].mxu1 }
 0x1c9   :  { %258 = vst.msk [vmem:[%s449_s6 + $0x10] sm:$0xff] %vm49_vm0, %v256_v41  ;;  %v243_v44 = vsel %vm237_vm2, %v217_v39, 0.0  ;;  %v220_v45 = vadd.f32 %v268_v33, %v219_v43 }
 0x1ca   :  { %245 = vst.msk [vmem:[%s449_s6] sm:$0xff] %vm49_vm0, %v243_v44  ;;  %v257_v46 = vsel %vm251_vm3, %v228_v42, 0.0 }
 0x1cb   :  { %259 = vst.msk [vmem:[%s449_s6 + $0x18] sm:$0xff] %vm49_vm0, %v257_v46  ;;  %v244_v47 = vsel %vm238_vm4, %v220_v45, 0.0 }
 0x1cc   :  { %246 = vst.msk [vmem:[%s449_s6 + $0x8] sm:$0xff] %vm49_vm0, %v244_v47 }

</bundles_post_ra>
